<compile_context>
chip_gen: v7x
topology: tpu7x:2x2x1
jax: 0.10.0
libtpu: 0.0.40
codegen_flags: <defaults>
</compile_context>

<pallas_src>
import functools
import math

import jax
import jax.numpy as jnp
import numpy as np
from jax.experimental import pallas as pl
from jax.experimental.pallas import tpu as pltpu


# ---------------------------------------------------------------------------
# Kernel
# ---------------------------------------------------------------------------
def _encoder_layer_kernel(
    x_ref,        # (M, D)     M = Bb * L rows of the current batch block
    wqkv_ref,     # (D, 3D)    in_proj weight, pre-transposed, q-scale folded in
    wo_ref,       # (D, D)     out_proj weight, pre-transposed
    wf1_ref,      # (D, F)     feed_forward[0] weight, pre-transposed
    wf2_ref,      # (F, D)     feed_forward[3] weight, pre-transposed
    pvec_ref,     # (9, D)     [g1, b1, g2, b2, bo, bf2, bq, bk, bv] (f32)
    bf1_ref,      # (1, F)     feed_forward[0] bias (f32)
    y_ref,        # (M, D)     output
    *attn_refs,   # optionally (M, L_pad) head-averaged attention weights
    num_heads: int,
    seq_len: int,
    d_model: int,
    ffn_chunk: int,
    compute_dtype,
    approx_recip: bool,
):
    L, D, H = seq_len, d_model, num_heads
    hd = D // H
    M = x_ref.shape[0]
    Bb = M // L
    eps = 1e-5
    cdt = compute_dtype
    attn_ref = attn_refs[0] if attn_refs else None

    pvec = pvec_ref[...]                      # (9, D) f32
    g1, b1, g2, b2 = pvec[0], pvec[1], pvec[2], pvec[3]
    bo, bf2 = pvec[4], pvec[5]
    bq, bk, bv = pvec[6], pvec[7], pvec[8]

    x = x_ref[...].astype(jnp.float32)        # (M, D)

    # ---- LayerNorm 1 (f32) ----
    mu1 = jnp.mean(x, axis=-1, keepdims=True)
    var1 = jnp.mean((x - mu1) ** 2, axis=-1, keepdims=True)
    xn = (x - mu1) * jax.lax.rsqrt(var1 + eps) * g1 + b1

    # ---- QKV projection: one (M, D) x (D, 3D) MXU matmul, bf16 in / f32 acc ----
    qkv = jnp.dot(xn.astype(cdt), wqkv_ref[...],
                  preferred_element_type=jnp.float32)          # (M, 3D) f32
    # q already carries the 1/sqrt(hd) scale (folded into weight + bias).
    q = (qkv[:, 0 * D:1 * D] + bq).reshape(Bb, L, D).astype(cdt)
    k = (qkv[:, 1 * D:2 * D] + bk).reshape(Bb, L, D).astype(cdt)
    v = (qkv[:, 2 * D:3 * D] + bv).reshape(Bb, L, D).astype(cdt)

    # ---- Multi-head attention (Bb-batched einsums per head) ----
    # Head outputs are concatenated lane-contiguously so out_proj is a single
    # full-width (M, D) x (D, D) MXU matmul.
    oh_parts = []
    attn_acc = None
    for h in range(H):
        sl = slice(h * hd, (h + 1) * hd)
        s = jnp.einsum("bqd,bkd->bqk", q[..., sl], k[..., sl],
                       preferred_element_type=jnp.float32)     # (Bb, L, L) f32
        s = s - jnp.max(s, axis=-1, keepdims=True)
        p = jnp.exp(s)
        p = p * pl.reciprocal(jnp.sum(p, axis=-1, keepdims=True),
                              approx=approx_recip)
        if attn_ref is not None:
            attn_acc = p if attn_acc is None else attn_acc + p
        oh_parts.append(
            jnp.einsum("bqk,bkd->bqd", p.astype(cdt), v[..., sl],
                       preferred_element_type=jnp.float32))    # (Bb, L, hd) f32

    o = jnp.concatenate(oh_parts, axis=-1).reshape(M, D)        # (M, D) f32
    attn_out = jnp.dot(o.astype(cdt), wo_ref[...],
                       preferred_element_type=jnp.float32) + bo

    # dropout -> identity (eval), residual add
    x1 = x + attn_out                                           # (M, D) f32

    if attn_ref is not None:
        # Lane-dense store: pad last dim up to a multiple of 128 with zeros.
        Lp = attn_ref.shape[-1]
        a2d = (attn_acc * (1.0 / H)).reshape(M, L)
        if Lp > L:
            a2d = jnp.concatenate(
                [a2d, jnp.zeros((M, Lp - L), jnp.float32)], axis=-1)
        attn_ref[...] = a2d.astype(attn_ref.dtype)

    # ---- LayerNorm 2 (f32) ----
    mu2 = jnp.mean(x1, axis=-1, keepdims=True)
    var2 = jnp.mean((x1 - mu2) ** 2, axis=-1, keepdims=True)
    x2n = ((x1 - mu2) * jax.lax.rsqrt(var2 + eps) * g2 + b2).astype(cdt)

    # ---- Feed forward: Linear -> ReLU -> (Dropout=id) -> Linear ----
    # Tiled over F so the full (M, F) hidden activation is never live.
    F = wf1_ref.shape[1]
    bf1 = bf1_ref[0]
    ffo = jnp.zeros((M, D), jnp.float32)
    for f0 in range(0, F, ffn_chunk):
        f1 = min(f0 + ffn_chunk, F)
        hc = jnp.dot(x2n, wf1_ref[:, f0:f1],
                     preferred_element_type=jnp.float32) + bf1[f0:f1]
        hc = jnp.maximum(hc, 0.0).astype(cdt)
        ffo = ffo + jnp.dot(hc, wf2_ref[f0:f1, :],
                            preferred_element_type=jnp.float32)
    ffo = ffo + bf2

    y_ref[...] = (x1 + ffo).astype(y_ref.dtype)


# ---------------------------------------------------------------------------
# Host-side sizing helpers
# ---------------------------------------------------------------------------
def _ffn_chunk(F):
    if F <= 512:
        return F
    for c in (512, 256, 128):
        if F % c == 0:
            return c
    return F


def _vmem_budget_bytes():
    """Per-step VMEM budget with headroom (works on v5e/v6e/v7x)."""
    cap = None
    try:
        cap = int(pltpu.get_tpu_info().vmem_capacity_bytes)
    except Exception:
        cap = None
    if not cap or cap <= 0:
        cap = 64 << 20          # conservative default: v7x per-TensorCore VMEM
    return (cap * 3) // 4        # ~48 MiB on v7x, ~96 MiB on v5e/v6e


def _default_target_rows():
    """128 M-rows saturate v5e's 128-wide MXU; 256 for v6e/v7x."""
    try:
        kind = jax.devices()[0].device_kind.lower()
        if "v5 lite" in kind or "v5e" in kind:
            return 128
    except Exception:
        pass
    return 256


def _estimate_vmem_bytes(Bb, L, D, F, H, need_weights, attn_pad, compute_dtype):
    """Rough per-grid-step VMEM footprint (pipelined I/O + weights + live temps)."""
    M = Bb * L
    f32 = 4
    cb = int(np.dtype(compute_dtype).itemsize)
    fc = _ffn_chunk(F)
    total = 2 * 2 * M * D * f32                      # x in + y out, double-buffered
    if need_weights:
        total += 2 * M * attn_pad * f32              # attn out, double-buffered
    total += (3 * D * D + D * D + 2 * D * F) * cb    # weights, single-buffered
    total += (9 * D + F) * f32                       # bias slab + bf1
    total += M * D * f32                             # x (f32 copy)
    total += M * 3 * D * (f32 + cb)                  # qkv f32 + bf16 q/k/v
    total += 3 * Bb * L * L * f32                    # s, p, attn_acc
    total += 3 * M * D * f32                         # o concat, attn_out, x1
    total += M * fc * (f32 + cb)                     # ffn chunk (f32 + bf16)
    total += 2 * M * D * f32                         # x2n, ffo
    return total


def _pick_block_b(B, L, D, F, H, need_weights, attn_pad, compute_dtype,
                  vmem_budget, target_rows):
    """Pick Bb (divisor of B): prefer >=2 grid steps (v7x megacore / pipelining),
    fit the VMEM budget, and feed >= target_rows M-rows to the MXU per step."""
    divs = [bb for bb in range(1, B + 1) if B % bb == 0]
    cands = [bb for bb in divs if (bb * L) % 8 == 0 or bb == B]
    if not cands:
        cands = [B]
    multi = [bb for bb in cands if B // bb >= 2]
    if multi:
        cands = multi
    fitting = [bb for bb in cands
               if _estimate_vmem_bytes(bb, L, D, F, H, need_weights, attn_pad,
                                       compute_dtype) <= vmem_budget]
    if not fitting:
        fitting = cands[:1]
    for bb in fitting:
        if bb * L >= target_rows:
            return bb            # smallest block that already saturates MXU rows
    return fitting[-1]           # otherwise the biggest block that still fits


# ---------------------------------------------------------------------------
# Wrapper
# ---------------------------------------------------------------------------
def transformer_encoder_layer(x, params, *, num_heads, need_weights=True,
                              block_b=None, compute_dtype=jnp.bfloat16):
    """x: (B, L, D) float32. params: PyTorch-layout weights (see __main__)."""
    B, L, D = x.shape
    F = params["wf1"].shape[0]
    assert D % num_heads == 0
    hd = D // num_heads

    attn_pad = ((L + 127) // 128) * 128 if need_weights else 0
    vmem_budget = _vmem_budget_bytes()
    if block_b is not None:
        Bb = block_b
    else:
        Bb = _pick_block_b(B, L, D, F, num_heads, need_weights, attn_pad,
                           compute_dtype, vmem_budget, _default_target_rows())
    assert B % Bb == 0
    M = Bb * L
    ffn_chunk = _ffn_chunk(F)

    # ---- Host/XLA-side weight prep (runs once, outside the grid) ----
    # Pre-transpose everything, fold 1/sqrt(head_dim) into the q rows of
    # in_proj weight + bias, cast matmul weights to the MXU compute dtype.
    scale = 1.0 / math.sqrt(hd)
    row_scale = jnp.concatenate([jnp.full((D,), scale, jnp.float32),
                                 jnp.ones((2 * D,), jnp.float32)])
    wqkv_t = (params["wqkv"].astype(jnp.float32)
              * row_scale[:, None]).T.astype(compute_dtype)       # (D, 3D)
    bqkv_s = params["bqkv"].astype(jnp.float32) * row_scale        # (3D,)
    wo_t = params["wo"].astype(jnp.float32).T.astype(compute_dtype)    # (D, D)
    wf1_t = params["wf1"].astype(jnp.float32).T.astype(compute_dtype)  # (D, F)
    wf2_t = params["wf2"].astype(jnp.float32).T.astype(compute_dtype)  # (F, D)
    pvec = jnp.stack(
        [params["g1"], params["b1"], params["g2"], params["b2"],
         params["bo"], params["bf2"],
         bqkv_s[:D], bqkv_s[D:2 * D], bqkv_s[2 * D:]],
        axis=0).astype(jnp.float32)                                # (9, D)
    bf1 = params["bf1"].astype(jnp.float32).reshape(1, F)

    x2d = x.reshape(B * L, D)

    kernel = functools.partial(
        _encoder_layer_kernel,
        num_heads=num_heads, seq_len=L, d_model=D, ffn_chunk=ffn_chunk,
        compute_dtype=compute_dtype,
        approx_recip=bool(np.dtype(compute_dtype) != np.dtype(jnp.float32)))

    def const(shape):
        n = len(shape)
        return pl.BlockSpec(shape, lambda i, _n=n: (0,) * _n,
                            pipeline_mode=pl.Buffered(1))

    in_specs = [
        pl.BlockSpec((M, D), lambda i: (i, 0)),   # x block: Bb whole sequences
        const((D, 3 * D)),                        # in_proj weight
        const((D, D)),                            # out_proj weight
        const((D, F)),                            # ff1 weight
        const((F, D)),                            # ff2 weight
        const((9, D)),                            # coalesced LN params / biases
        const((1, F)),                            # ff1 bias
    ]
    out_specs = [pl.BlockSpec((M, D), lambda i: (i, 0))]
    out_shape = [jax.ShapeDtypeStruct((B * L, D), x.dtype)]
    if need_weights:
        out_specs.append(pl.BlockSpec((M, attn_pad), lambda i: (i, 0)))
        out_shape.append(jax.ShapeDtypeStruct((B * L, attn_pad), jnp.float32))

    est = _estimate_vmem_bytes(Bb, L, D, F, num_heads, need_weights, attn_pad,
                               compute_dtype)
    vmem_limit = int(min(vmem_budget, max(2 * est, 32 << 20)))

    outs = pl.pallas_call(
        kernel,
        grid_spec=pltpu.PrefetchScalarGridSpec(
            num_scalar_prefetch=0,
            grid=(B // Bb,),
            in_specs=in_specs,
            out_specs=tuple(out_specs)),
        out_shape=tuple(out_shape),
        compiler_params=pltpu.CompilerParams(
            dimension_semantics=("parallel",),
            vmem_limit_bytes=vmem_limit),
    )(x2d, wqkv_t, wo_t, wf1_t, wf2_t, pvec, bf1)

    if not isinstance(outs, (list, tuple)):
        outs = (outs,)
    y = outs[0].reshape(B, L, D)
    if need_weights:
        attn = outs[1][:, :L].reshape(B, L, L)
        return y, attn
    return y, None


# ---------------------------------------------------------------------------
# Pure-JAX reference (mirrors PyTorch eval-mode forward)
# ---------------------------------------------------------------------------
def _reference(x, p, num_heads):
    D = x.shape[-1]
    hd = D // num_heads
    eps = 1e-5

    def ln(v, g, b):
        m = jnp.mean(v, axis=-1, keepdims=True)
        s = jnp.mean((v - m) ** 2, axis=-1, keepdims=True)
        return (v - m) / jnp.sqrt(s + eps) * g + b

    residual = x
    xn = ln(x, p["g1"], p["b1"])
    qkv = jnp.einsum("bld,ed->ble", xn, p["wqkv"]) + p["bqkv"]
    q, k, v = jnp.split(qkv, 3, axis=-1)
    B, L, _ = x.shape
    q = q.reshape(B, L, num_heads, hd).transpose(0, 2, 1, 3) / math.sqrt(hd)
    k = k.reshape(B, L, num_heads, hd).transpose(0, 2, 1, 3)
    v = v.reshape(B, L, num_heads, hd).transpose(0, 2, 1, 3)
    s = jnp.einsum("bhqd,bhkd->bhqk", q, k)
    pw = jax.nn.softmax(s, axis=-1)
    ao = jnp.einsum("bhqk,bhkd->bhqd", pw, v).transpose(0, 2, 1, 3).reshape(B, L, D)
    ao = jnp.einsum("bld,ed->ble", ao, p["wo"]) + p["bo"]
    x1 = residual + ao
    xn2 = ln(x1, p["g2"], p["b2"])
    h = jax.nn.relu(jnp.einsum("bld,fd->blf", xn2, p["wf1"]) + p["bf1"])
    y = jnp.einsum("blf,df->bld", h, p["wf2"]) + p["bf2"]
    return x1 + y, jnp.mean(pw, axis=1)


if __name__ == "__main__":
    # config: d_model=32, num_attention_heads=4, feedforward_dim=64
    B, L, D, H, F = 2, 8, 32, 4, 64

    key = jax.random.PRNGKey(0)
    ks = jax.random.split(key, 16)
    init = lambda k, shape, scale=0.05: scale * jax.random.normal(k, shape, jnp.float32)

    params = {
        "wqkv": init(ks[0], (3 * D, D)),
        "bqkv": init(ks[1], (3 * D,)),
        "wo":   init(ks[2], (D, D)),
        "bo":   init(ks[3], (D,)),
        "g1":   jnp.ones((D,), jnp.float32) + init(ks[4], (D,)),
        "b1":   init(ks[5], (D,)),
        "g2":   jnp.ones((D,), jnp.float32) + init(ks[6], (D,)),
        "b2":   init(ks[7], (D,)),
        "wf1":  init(ks[8], (F, D)),
        "bf1":  init(ks[9], (F,)),
        "wf2":  init(ks[10], (D, F)),
        "bf2":  init(ks[11], (D,)),
    }
    x = jax.random.normal(ks[12], (B, L, D), jnp.float32)

    y_ref, attn_ref = _reference(x, params, H)

    # Exact f32 path: validates the math to tight tolerance.
    y32, attn32 = transformer_encoder_layer(x, params, num_heads=H,
                                            compute_dtype=jnp.float32)
    jax.block_until_ready((y32, attn32))
    np.testing.assert_allclose(np.asarray(y32), np.asarray(y_ref), rtol=1e-4, atol=1e-4)
    np.testing.assert_allclose(np.asarray(attn32), np.asarray(attn_ref), rtol=1e-4, atol=1e-4)

    # Production bf16-MXU path (f32 accumulation): relaxed tolerance.
    y16, attn16 = transformer_encoder_layer(x, params, num_heads=H)
    jax.block_until_ready((y16, attn16))
    np.testing.assert_allclose(np.asarray(y16), np.asarray(y_ref), rtol=3e-2, atol=3e-2)
    np.testing.assert_allclose(np.asarray(attn16), np.asarray(attn_ref), rtol=3e-2, atol=3e-2)

    # need_weights=False fast path (PatchTST usually discards attention maps).
    y2, attn2 = transformer_encoder_layer(x, params, num_heads=H, need_weights=False)
    jax.block_until_ready(y2)
    assert attn2 is None
    np.testing.assert_allclose(np.asarray(y2), np.asarray(y_ref), rtol=3e-2, atol=3e-2)

    print("KERNEL_OK")
</pallas_src>

<mosaic_0001>
module attributes {stable_mosaic.version = 11 : i64} {
  func.func @_encoder_layer_kernel(%arg0: i32, %arg1: memref<8x32xf32, #tpu.memory_space<vmem>>, %arg2: memref<32x96xf32, #tpu.memory_space<vmem>>, %arg3: memref<32x32xf32, #tpu.memory_space<vmem>>, %arg4: memref<32x64xf32, #tpu.memory_space<vmem>>, %arg5: memref<64x32xf32, #tpu.memory_space<vmem>>, %arg6: memref<9x32xf32, #tpu.memory_space<vmem>>, %arg7: memref<1x64xf32, #tpu.memory_space<vmem>>, %arg8: memref<8x32xf32, #tpu.memory_space<vmem>>, %arg9: memref<8x128xf32, #tpu.memory_space<vmem>>) attributes {dimension_semantics = [#tpu.dimension_semantics<parallel>], iteration_bounds = array<i64: 2>, scalar_prefetch = 0 : i64, scratch_operands = 0 : i64, tpu.core_type = #tpu.core_type<tc>, window_params = [{transform_indices = @transform_0, window_bounds = array<i64: 8, 32>}, {pipeline_mode = #tpu.pipeline_mode<synchronous>, transform_indices = @transform_1, window_bounds = array<i64: 32, 96>}, {pipeline_mode = #tpu.pipeline_mode<synchronous>, transform_indices = @transform_2, window_bounds = array<i64: 32, 32>}, {pipeline_mode = #tpu.pipeline_mode<synchronous>, transform_indices = @transform_3, window_bounds = array<i64: 32, 64>}, {pipeline_mode = #tpu.pipeline_mode<synchronous>, transform_indices = @transform_4, window_bounds = array<i64: 64, 32>}, {pipeline_mode = #tpu.pipeline_mode<synchronous>, transform_indices = @transform_5, window_bounds = array<i64: 9, 32>}, {pipeline_mode = #tpu.pipeline_mode<synchronous>, transform_indices = @transform_6, window_bounds = array<i64: 1, 64>}, {transform_indices = @transform_7, window_bounds = array<i64: 8, 32>}, {transform_indices = @transform_8, window_bounds = array<i64: 8, 128>}]} {
    %c0 = arith.constant 0 : index
    %c0_0 = arith.constant 0 : index
    %0 = vector.load %arg6[%c0, %c0_0] : memref<9x32xf32, #tpu.memory_space<vmem>>, vector<9x32xf32>
    %1 = vector.extract_strided_slice %0 {offsets = [0, 0], sizes = [1, 32], strides = [1, 1]} : vector<9x32xf32> to vector<1x32xf32>
    %2 = vector.shape_cast %1 : vector<1x32xf32> to vector<32xf32>
    %3 = vector.extract_strided_slice %0 {offsets = [1, 0], sizes = [1, 32], strides = [1, 1]} : vector<9x32xf32> to vector<1x32xf32>
    %4 = vector.shape_cast %3 : vector<1x32xf32> to vector<32xf32>
    %5 = vector.extract_strided_slice %0 {offsets = [2, 0], sizes = [1, 32], strides = [1, 1]} : vector<9x32xf32> to vector<1x32xf32>
    %6 = vector.shape_cast %5 : vector<1x32xf32> to vector<32xf32>
    %7 = vector.extract_strided_slice %0 {offsets = [3, 0], sizes = [1, 32], strides = [1, 1]} : vector<9x32xf32> to vector<1x32xf32>
    %8 = vector.shape_cast %7 : vector<1x32xf32> to vector<32xf32>
    %9 = vector.extract_strided_slice %0 {offsets = [4, 0], sizes = [1, 32], strides = [1, 1]} : vector<9x32xf32> to vector<1x32xf32>
    %10 = vector.shape_cast %9 : vector<1x32xf32> to vector<32xf32>
    %11 = vector.extract_strided_slice %0 {offsets = [5, 0], sizes = [1, 32], strides = [1, 1]} : vector<9x32xf32> to vector<1x32xf32>
    %12 = vector.shape_cast %11 : vector<1x32xf32> to vector<32xf32>
    %13 = vector.extract_strided_slice %0 {offsets = [6, 0], sizes = [1, 32], strides = [1, 1]} : vector<9x32xf32> to vector<1x32xf32>
    %14 = vector.shape_cast %13 : vector<1x32xf32> to vector<32xf32>
    %15 = vector.extract_strided_slice %0 {offsets = [7, 0], sizes = [1, 32], strides = [1, 1]} : vector<9x32xf32> to vector<1x32xf32>
    %16 = vector.shape_cast %15 : vector<1x32xf32> to vector<32xf32>
    %17 = vector.extract_strided_slice %0 {offsets = [8, 0], sizes = [1, 32], strides = [1, 1]} : vector<9x32xf32> to vector<1x32xf32>
    %18 = vector.shape_cast %17 : vector<1x32xf32> to vector<32xf32>
    %c0_1 = arith.constant 0 : index
    %c0_2 = arith.constant 0 : index
    %19 = vector.load %arg1[%c0_1, %c0_2] : memref<8x32xf32, #tpu.memory_space<vmem>>, vector<8x32xf32>
    %cst = arith.constant dense<0.000000e+00> : vector<8xf32>
    %20 = vector.multi_reduction <add>, %19, %cst [1] : vector<8x32xf32> to vector<8xf32>
    %21 = vector.shape_cast %20 : vector<8xf32> to vector<8x1xf32>
    %cst_3 = arith.constant 3.200000e+01 : f32
    %22 = vector.broadcast %cst_3 : f32 to vector<8x1xf32>
    %23 = arith.divf %21, %22 : vector<8x1xf32>
    %24 = vector.broadcast %23 : vector<8x1xf32> to vector<8x32xf32>
    %25 = arith.subf %19, %24 : vector<8x32xf32>
    %26 = arith.mulf %25, %25 : vector<8x32xf32>
    %cst_4 = arith.constant dense<0.000000e+00> : vector<8xf32>
    %27 = vector.multi_reduction <add>, %26, %cst_4 [1] : vector<8x32xf32> to vector<8xf32>
    %28 = vector.shape_cast %27 : vector<8xf32> to vector<8x1xf32>
    %cst_5 = arith.constant 3.200000e+01 : f32
    %29 = vector.broadcast %cst_5 : f32 to vector<8x1xf32>
    %30 = arith.divf %28, %29 : vector<8x1xf32>
    %31 = vector.broadcast %23 : vector<8x1xf32> to vector<8x32xf32>
    %32 = arith.subf %19, %31 : vector<8x32xf32>
    %cst_6 = arith.constant 9.99999974E-6 : f32
    %33 = vector.broadcast %cst_6 : f32 to vector<8x1xf32>
    %34 = arith.addf %30, %33 : vector<8x1xf32>
    %35 = math.rsqrt %34 : vector<8x1xf32>
    %36 = vector.broadcast %35 : vector<8x1xf32> to vector<8x32xf32>
    %37 = arith.mulf %32, %36 : vector<8x32xf32>
    %38 = vector.shape_cast %2 : vector<32xf32> to vector<1x32xf32>
    %39 = vector.broadcast %38 : vector<1x32xf32> to vector<8x32xf32>
    %40 = arith.mulf %37, %39 : vector<8x32xf32>
    %41 = vector.shape_cast %4 : vector<32xf32> to vector<1x32xf32>
    %42 = vector.broadcast %41 : vector<1x32xf32> to vector<8x32xf32>
    %43 = arith.addf %40, %42 : vector<8x32xf32>
    %c0_7 = arith.constant 0 : index
    %c0_8 = arith.constant 0 : index
    %44 = vector.load %arg2[%c0_7, %c0_8] : memref<32x96xf32, #tpu.memory_space<vmem>>, vector<32x96xf32>
    %cst_9 = arith.constant dense<0.000000e+00> : vector<8x96xf32>
    %45 = tpu.matmul %43, %44, %cst_9 {dimension_numbers = #tpu.dot_dimension_numbers<[1], [0], [0], [1], [0, 0, 1, 1], [], []>} : vector<8x32xf32>, vector<32x96xf32>, vector<8x96xf32> -> vector<8x96xf32>
    %46 = vector.extract_strided_slice %45 {offsets = [0, 0], sizes = [8, 32], strides = [1, 1]} : vector<8x96xf32> to vector<8x32xf32>
    %47 = vector.shape_cast %14 : vector<32xf32> to vector<1x32xf32>
    %48 = vector.broadcast %47 : vector<1x32xf32> to vector<8x32xf32>
    %49 = arith.addf %46, %48 : vector<8x32xf32>
    %50 = vector.shape_cast %49 : vector<8x32xf32> to vector<1x8x32xf32>
    %51 = vector.extract_strided_slice %45 {offsets = [0, 32], sizes = [8, 32], strides = [1, 1]} : vector<8x96xf32> to vector<8x32xf32>
    %52 = vector.shape_cast %16 : vector<32xf32> to vector<1x32xf32>
    %53 = vector.broadcast %52 : vector<1x32xf32> to vector<8x32xf32>
    %54 = arith.addf %51, %53 : vector<8x32xf32>
    %55 = vector.shape_cast %54 : vector<8x32xf32> to vector<1x8x32xf32>
    %56 = vector.extract_strided_slice %45 {offsets = [0, 64], sizes = [8, 32], strides = [1, 1]} : vector<8x96xf32> to vector<8x32xf32>
    %57 = vector.shape_cast %18 : vector<32xf32> to vector<1x32xf32>
    %58 = vector.broadcast %57 : vector<1x32xf32> to vector<8x32xf32>
    %59 = arith.addf %56, %58 : vector<8x32xf32>
    %60 = vector.shape_cast %59 : vector<8x32xf32> to vector<1x8x32xf32>
    %61 = vector.extract_strided_slice %50 {offsets = [0, 0, 0], sizes = [1, 8, 8], strides = [1, 1, 1]} : vector<1x8x32xf32> to vector<1x8x8xf32>
    %62 = vector.extract_strided_slice %55 {offsets = [0, 0, 0], sizes = [1, 8, 8], strides = [1, 1, 1]} : vector<1x8x32xf32> to vector<1x8x8xf32>
    "tpu.trace_start"() <{level = 10 : i32, message = "bqd,bkd->bqk"}> : () -> ()
    %cst_10 = arith.constant dense<0.000000e+00> : vector<1x8x8xf32>
    %63 = tpu.matmul %61, %62, %cst_10 {dimension_numbers = #tpu.dot_dimension_numbers<[2], [2], [1], [1], [0, 0, 0, 1, 1, 1], [0], [0]>} : vector<1x8x8xf32>, vector<1x8x8xf32>, vector<1x8x8xf32> -> vector<1x8x8xf32>
    "tpu.trace_stop"() : () -> ()
    %cst_11 = arith.constant dense<0xFF800000> : vector<1x8xf32>
    %64 = vector.multi_reduction <maximumf>, %63, %cst_11 [2] : vector<1x8x8xf32> to vector<1x8xf32>
    %65 = vector.shape_cast %64 : vector<1x8xf32> to vector<1x8x1xf32>
    %66 = vector.broadcast %65 : vector<1x8x1xf32> to vector<1x8x8xf32>
    %67 = arith.subf %63, %66 : vector<1x8x8xf32>
    %68 = math.exp %67 : vector<1x8x8xf32>
    %cst_12 = arith.constant dense<0.000000e+00> : vector<1x8xf32>
    %69 = vector.multi_reduction <add>, %68, %cst_12 [2] : vector<1x8x8xf32> to vector<1x8xf32>
    %70 = vector.shape_cast %69 : vector<1x8xf32> to vector<1x8x1xf32>
    %71 = tpu.reciprocal %70 : vector<1x8x1xf32> -> vector<1x8x1xf32>
    %72 = vector.broadcast %71 : vector<1x8x1xf32> to vector<1x8x8xf32>
    %73 = arith.mulf %68, %72 : vector<1x8x8xf32>
    %74 = vector.extract_strided_slice %60 {offsets = [0, 0, 0], sizes = [1, 8, 8], strides = [1, 1, 1]} : vector<1x8x32xf32> to vector<1x8x8xf32>
    "tpu.trace_start"() <{level = 10 : i32, message = "bqk,bkd->bqd"}> : () -> ()
    %cst_13 = arith.constant dense<0.000000e+00> : vector<1x8x8xf32>
    %75 = tpu.matmul %73, %74, %cst_13 {dimension_numbers = #tpu.dot_dimension_numbers<[2], [1], [1], [2], [0, 0, 0, 1, 1, 2], [0], [0]>} : vector<1x8x8xf32>, vector<1x8x8xf32>, vector<1x8x8xf32> -> vector<1x8x8xf32>
    "tpu.trace_stop"() : () -> ()
    %76 = vector.extract_strided_slice %50 {offsets = [0, 0, 8], sizes = [1, 8, 8], strides = [1, 1, 1]} : vector<1x8x32xf32> to vector<1x8x8xf32>
    %77 = vector.extract_strided_slice %55 {offsets = [0, 0, 8], sizes = [1, 8, 8], strides = [1, 1, 1]} : vector<1x8x32xf32> to vector<1x8x8xf32>
    "tpu.trace_start"() <{level = 10 : i32, message = "bqd,bkd->bqk"}> : () -> ()
    %cst_14 = arith.constant dense<0.000000e+00> : vector<1x8x8xf32>
    %78 = tpu.matmul %76, %77, %cst_14 {dimension_numbers = #tpu.dot_dimension_numbers<[2], [2], [1], [1], [0, 0, 0, 1, 1, 1], [0], [0]>} : vector<1x8x8xf32>, vector<1x8x8xf32>, vector<1x8x8xf32> -> vector<1x8x8xf32>
    "tpu.trace_stop"() : () -> ()
    %cst_15 = arith.constant dense<0xFF800000> : vector<1x8xf32>
    %79 = vector.multi_reduction <maximumf>, %78, %cst_15 [2] : vector<1x8x8xf32> to vector<1x8xf32>
    %80 = vector.shape_cast %79 : vector<1x8xf32> to vector<1x8x1xf32>
    %81 = vector.broadcast %80 : vector<1x8x1xf32> to vector<1x8x8xf32>
    %82 = arith.subf %78, %81 : vector<1x8x8xf32>
    %83 = math.exp %82 : vector<1x8x8xf32>
    %cst_16 = arith.constant dense<0.000000e+00> : vector<1x8xf32>
    %84 = vector.multi_reduction <add>, %83, %cst_16 [2] : vector<1x8x8xf32> to vector<1x8xf32>
    %85 = vector.shape_cast %84 : vector<1x8xf32> to vector<1x8x1xf32>
    %86 = tpu.reciprocal %85 : vector<1x8x1xf32> -> vector<1x8x1xf32>
    %87 = vector.broadcast %86 : vector<1x8x1xf32> to vector<1x8x8xf32>
    %88 = arith.mulf %83, %87 : vector<1x8x8xf32>
    %89 = arith.addf %73, %88 : vector<1x8x8xf32>
    %90 = vector.extract_strided_slice %60 {offsets = [0, 0, 8], sizes = [1, 8, 8], strides = [1, 1, 1]} : vector<1x8x32xf32> to vector<1x8x8xf32>
    "tpu.trace_start"() <{level = 10 : i32, message = "bqk,bkd->bqd"}> : () -> ()
    %cst_17 = arith.constant dense<0.000000e+00> : vector<1x8x8xf32>
    %91 = tpu.matmul %88, %90, %cst_17 {dimension_numbers = #tpu.dot_dimension_numbers<[2], [1], [1], [2], [0, 0, 0, 1, 1, 2], [0], [0]>} : vector<1x8x8xf32>, vector<1x8x8xf32>, vector<1x8x8xf32> -> vector<1x8x8xf32>
    "tpu.trace_stop"() : () -> ()
    %92 = vector.extract_strided_slice %50 {offsets = [0, 0, 16], sizes = [1, 8, 8], strides = [1, 1, 1]} : vector<1x8x32xf32> to vector<1x8x8xf32>
    %93 = vector.extract_strided_slice %55 {offsets = [0, 0, 16], sizes = [1, 8, 8], strides = [1, 1, 1]} : vector<1x8x32xf32> to vector<1x8x8xf32>
    "tpu.trace_start"() <{level = 10 : i32, message = "bqd,bkd->bqk"}> : () -> ()
    %cst_18 = arith.constant dense<0.000000e+00> : vector<1x8x8xf32>
    %94 = tpu.matmul %92, %93, %cst_18 {dimension_numbers = #tpu.dot_dimension_numbers<[2], [2], [1], [1], [0, 0, 0, 1, 1, 1], [0], [0]>} : vector<1x8x8xf32>, vector<1x8x8xf32>, vector<1x8x8xf32> -> vector<1x8x8xf32>
    "tpu.trace_stop"() : () -> ()
    %cst_19 = arith.constant dense<0xFF800000> : vector<1x8xf32>
    %95 = vector.multi_reduction <maximumf>, %94, %cst_19 [2] : vector<1x8x8xf32> to vector<1x8xf32>
    %96 = vector.shape_cast %95 : vector<1x8xf32> to vector<1x8x1xf32>
    %97 = vector.broadcast %96 : vector<1x8x1xf32> to vector<1x8x8xf32>
    %98 = arith.subf %94, %97 : vector<1x8x8xf32>
    %99 = math.exp %98 : vector<1x8x8xf32>
    %cst_20 = arith.constant dense<0.000000e+00> : vector<1x8xf32>
    %100 = vector.multi_reduction <add>, %99, %cst_20 [2] : vector<1x8x8xf32> to vector<1x8xf32>
    %101 = vector.shape_cast %100 : vector<1x8xf32> to vector<1x8x1xf32>
    %102 = tpu.reciprocal %101 : vector<1x8x1xf32> -> vector<1x8x1xf32>
    %103 = vector.broadcast %102 : vector<1x8x1xf32> to vector<1x8x8xf32>
    %104 = arith.mulf %99, %103 : vector<1x8x8xf32>
    %105 = arith.addf %89, %104 : vector<1x8x8xf32>
    %106 = vector.extract_strided_slice %60 {offsets = [0, 0, 16], sizes = [1, 8, 8], strides = [1, 1, 1]} : vector<1x8x32xf32> to vector<1x8x8xf32>
    "tpu.trace_start"() <{level = 10 : i32, message = "bqk,bkd->bqd"}> : () -> ()
    %cst_21 = arith.constant dense<0.000000e+00> : vector<1x8x8xf32>
    %107 = tpu.matmul %104, %106, %cst_21 {dimension_numbers = #tpu.dot_dimension_numbers<[2], [1], [1], [2], [0, 0, 0, 1, 1, 2], [0], [0]>} : vector<1x8x8xf32>, vector<1x8x8xf32>, vector<1x8x8xf32> -> vector<1x8x8xf32>
    "tpu.trace_stop"() : () -> ()
    %108 = vector.extract_strided_slice %50 {offsets = [0, 0, 24], sizes = [1, 8, 8], strides = [1, 1, 1]} : vector<1x8x32xf32> to vector<1x8x8xf32>
    %109 = vector.extract_strided_slice %55 {offsets = [0, 0, 24], sizes = [1, 8, 8], strides = [1, 1, 1]} : vector<1x8x32xf32> to vector<1x8x8xf32>
    "tpu.trace_start"() <{level = 10 : i32, message = "bqd,bkd->bqk"}> : () -> ()
    %cst_22 = arith.constant dense<0.000000e+00> : vector<1x8x8xf32>
    %110 = tpu.matmul %108, %109, %cst_22 {dimension_numbers = #tpu.dot_dimension_numbers<[2], [2], [1], [1], [0, 0, 0, 1, 1, 1], [0], [0]>} : vector<1x8x8xf32>, vector<1x8x8xf32>, vector<1x8x8xf32> -> vector<1x8x8xf32>
    "tpu.trace_stop"() : () -> ()
    %cst_23 = arith.constant dense<0xFF800000> : vector<1x8xf32>
    %111 = vector.multi_reduction <maximumf>, %110, %cst_23 [2] : vector<1x8x8xf32> to vector<1x8xf32>
    %112 = vector.shape_cast %111 : vector<1x8xf32> to vector<1x8x1xf32>
    %113 = vector.broadcast %112 : vector<1x8x1xf32> to vector<1x8x8xf32>
    %114 = arith.subf %110, %113 : vector<1x8x8xf32>
    %115 = math.exp %114 : vector<1x8x8xf32>
    %cst_24 = arith.constant dense<0.000000e+00> : vector<1x8xf32>
    %116 = vector.multi_reduction <add>, %115, %cst_24 [2] : vector<1x8x8xf32> to vector<1x8xf32>
    %117 = vector.shape_cast %116 : vector<1x8xf32> to vector<1x8x1xf32>
    %118 = tpu.reciprocal %117 : vector<1x8x1xf32> -> vector<1x8x1xf32>
    %119 = vector.broadcast %118 : vector<1x8x1xf32> to vector<1x8x8xf32>
    %120 = arith.mulf %115, %119 : vector<1x8x8xf32>
    %121 = arith.addf %105, %120 : vector<1x8x8xf32>
    %122 = vector.extract_strided_slice %60 {offsets = [0, 0, 24], sizes = [1, 8, 8], strides = [1, 1, 1]} : vector<1x8x32xf32> to vector<1x8x8xf32>
    "tpu.trace_start"() <{level = 10 : i32, message = "bqk,bkd->bqd"}> : () -> ()
    %cst_25 = arith.constant dense<0.000000e+00> : vector<1x8x8xf32>
    %123 = tpu.matmul %120, %122, %cst_25 {dimension_numbers = #tpu.dot_dimension_numbers<[2], [1], [1], [2], [0, 0, 0, 1, 1, 2], [0], [0]>} : vector<1x8x8xf32>, vector<1x8x8xf32>, vector<1x8x8xf32> -> vector<1x8x8xf32>
    "tpu.trace_stop"() : () -> ()
    %124 = tpu.concatenate %75, %91, %107, %123 in 2 : vector<1x8x8xf32>, vector<1x8x8xf32>, vector<1x8x8xf32>, vector<1x8x8xf32> -> vector<1x8x32xf32>
    %125 = vector.shape_cast %124 : vector<1x8x32xf32> to vector<8x32xf32>
    %c0_26 = arith.constant 0 : index
    %c0_27 = arith.constant 0 : index
    %126 = vector.load %arg3[%c0_26, %c0_27] : memref<32x32xf32, #tpu.memory_space<vmem>>, vector<32x32xf32>
    %cst_28 = arith.constant dense<0.000000e+00> : vector<8x32xf32>
    %127 = tpu.matmul %125, %126, %cst_28 {dimension_numbers = #tpu.dot_dimension_numbers<[1], [0], [0], [1], [0, 0, 1, 1], [], []>} : vector<8x32xf32>, vector<32x32xf32>, vector<8x32xf32> -> vector<8x32xf32>
    %128 = vector.shape_cast %10 : vector<32xf32> to vector<1x32xf32>
    %129 = vector.broadcast %128 : vector<1x32xf32> to vector<8x32xf32>
    %130 = arith.addf %127, %129 : vector<8x32xf32>
    %131 = arith.addf %19, %130 : vector<8x32xf32>
    %cst_29 = arith.constant 2.500000e-01 : f32
    %132 = vector.broadcast %cst_29 : f32 to vector<1x8x8xf32>
    %133 = arith.mulf %121, %132 : vector<1x8x8xf32>
    %134 = vector.shape_cast %133 : vector<1x8x8xf32> to vector<8x8xf32>
    %cst_30 = arith.constant 0.000000e+00 : f32
    %135 = vector.broadcast %cst_30 : f32 to vector<8x120xf32>
    %136 = tpu.concatenate %134, %135 in 1 : vector<8x8xf32>, vector<8x120xf32> -> vector<8x128xf32>
    %c0_31 = arith.constant 0 : index
    %c0_32 = arith.constant 0 : index
    %137 = vector.load %arg9[%c0_31, %c0_32] : memref<8x128xf32, #tpu.memory_space<vmem>>, vector<8x128xf32>
    tpu.vector_store %arg9[%c0_31, %c0_32], %136 {strides = array<i32>} : memref<8x128xf32, #tpu.memory_space<vmem>>, vector<8x128xf32>,
    %cst_33 = arith.constant dense<0.000000e+00> : vector<8xf32>
    %138 = vector.multi_reduction <add>, %131, %cst_33 [1] : vector<8x32xf32> to vector<8xf32>
    %139 = vector.shape_cast %138 : vector<8xf32> to vector<8x1xf32>
    %cst_34 = arith.constant 3.200000e+01 : f32
    %140 = vector.broadcast %cst_34 : f32 to vector<8x1xf32>
    %141 = arith.divf %139, %140 : vector<8x1xf32>
    %142 = vector.broadcast %141 : vector<8x1xf32> to vector<8x32xf32>
    %143 = arith.subf %131, %142 : vector<8x32xf32>
    %144 = arith.mulf %143, %143 : vector<8x32xf32>
    %cst_35 = arith.constant dense<0.000000e+00> : vector<8xf32>
    %145 = vector.multi_reduction <add>, %144, %cst_35 [1] : vector<8x32xf32> to vector<8xf32>
    %146 = vector.shape_cast %145 : vector<8xf32> to vector<8x1xf32>
    %cst_36 = arith.constant 3.200000e+01 : f32
    %147 = vector.broadcast %cst_36 : f32 to vector<8x1xf32>
    %148 = arith.divf %146, %147 : vector<8x1xf32>
    %149 = vector.broadcast %141 : vector<8x1xf32> to vector<8x32xf32>
    %150 = arith.subf %131, %149 : vector<8x32xf32>
    %cst_37 = arith.constant 9.99999974E-6 : f32
    %151 = vector.broadcast %cst_37 : f32 to vector<8x1xf32>
    %152 = arith.addf %148, %151 : vector<8x1xf32>
    %153 = math.rsqrt %152 : vector<8x1xf32>
    %154 = vector.broadcast %153 : vector<8x1xf32> to vector<8x32xf32>
    %155 = arith.mulf %150, %154 : vector<8x32xf32>
    %156 = vector.shape_cast %6 : vector<32xf32> to vector<1x32xf32>
    %157 = vector.broadcast %156 : vector<1x32xf32> to vector<8x32xf32>
    %158 = arith.mulf %155, %157 : vector<8x32xf32>
    %159 = vector.shape_cast %8 : vector<32xf32> to vector<1x32xf32>
    %160 = vector.broadcast %159 : vector<1x32xf32> to vector<8x32xf32>
    %161 = arith.addf %158, %160 : vector<8x32xf32>
    %c0_38 = arith.constant 0 : index
    %c0_39 = arith.constant 0 : index
    %162 = vector.load %arg7[%c0_38, %c0_39] : memref<1x64xf32, #tpu.memory_space<vmem>>, vector<1x64xf32>
    %163 = vector.shape_cast %162 : vector<1x64xf32> to vector<64xf32>
    %cst_40 = arith.constant 0.000000e+00 : f32
    %164 = vector.broadcast %cst_40 : f32 to vector<8x32xf32>
    %c0_41 = arith.constant 0 : index
    %c0_42 = arith.constant 0 : index
    %165 = vector.load %arg4[%c0_41, %c0_42] : memref<32x64xf32, #tpu.memory_space<vmem>>, vector<32x64xf32>
    %cst_43 = arith.constant dense<0.000000e+00> : vector<8x64xf32>
    %166 = tpu.matmul %161, %165, %cst_43 {dimension_numbers = #tpu.dot_dimension_numbers<[1], [0], [0], [1], [0, 0, 1, 1], [], []>} : vector<8x32xf32>, vector<32x64xf32>, vector<8x64xf32> -> vector<8x64xf32>
    %167 = vector.shape_cast %163 : vector<64xf32> to vector<1x64xf32>
    %168 = vector.broadcast %167 : vector<1x64xf32> to vector<8x64xf32>
    %169 = arith.addf %166, %168 : vector<8x64xf32>
    %cst_44 = arith.constant 0.000000e+00 : f32
    %170 = vector.broadcast %cst_44 : f32 to vector<8x64xf32>
    %171 = arith.maximumf %169, %170 : vector<8x64xf32>
    %c0_45 = arith.constant 0 : index
    %c0_46 = arith.constant 0 : index
    %172 = vector.load %arg5[%c0_45, %c0_46] : memref<64x32xf32, #tpu.memory_space<vmem>>, vector<64x32xf32>
    %cst_47 = arith.constant dense<0.000000e+00> : vector<8x32xf32>
    %173 = tpu.matmul %171, %172, %cst_47 {dimension_numbers = #tpu.dot_dimension_numbers<[1], [0], [0], [1], [0, 0, 1, 1], [], []>} : vector<8x64xf32>, vector<64x32xf32>, vector<8x32xf32> -> vector<8x32xf32>
    %174 = arith.addf %164, %173 : vector<8x32xf32>
    %175 = vector.shape_cast %12 : vector<32xf32> to vector<1x32xf32>
    %176 = vector.broadcast %175 : vector<1x32xf32> to vector<8x32xf32>
    %177 = arith.addf %174, %176 : vector<8x32xf32>
    %178 = arith.addf %131, %177 : vector<8x32xf32>
    %c0_48 = arith.constant 0 : index
    %c0_49 = arith.constant 0 : index
    %179 = vector.load %arg8[%c0_48, %c0_49] : memref<8x32xf32, #tpu.memory_space<vmem>>, vector<8x32xf32>
    tpu.vector_store %arg8[%c0_48, %c0_49], %178 {strides = array<i32>} : memref<8x32xf32, #tpu.memory_space<vmem>>, vector<8x32xf32>,
    return
  }
  func.func @transform_0(%arg0: i32) -> (i32, i32) {
    %c0_i32 = arith.constant 0 : i32
    %c0_i32_0 = arith.constant 0 : i32
    return %arg0, %c0_i32 : i32, i32
  }
  func.func @transform_1(%arg0: i32) -> (i32, i32) {
    %c0_i32 = arith.constant 0 : i32
    %c0_i32_0 = arith.constant 0 : i32
    %c0_i32_1 = arith.constant 0 : i32
    return %c0_i32, %c0_i32_0 : i32, i32
  }
  func.func @transform_2(%arg0: i32) -> (i32, i32) {
    %c0_i32 = arith.constant 0 : i32
    %c0_i32_0 = arith.constant 0 : i32
    %c0_i32_1 = arith.constant 0 : i32
    return %c0_i32, %c0_i32_0 : i32, i32
  }
  func.func @transform_3(%arg0: i32) -> (i32, i32) {
    %c0_i32 = arith.constant 0 : i32
    %c0_i32_0 = arith.constant 0 : i32
    %c0_i32_1 = arith.constant 0 : i32
    return %c0_i32, %c0_i32_0 : i32, i32
  }
  func.func @transform_4(%arg0: i32) -> (i32, i32) {
    %c0_i32 = arith.constant 0 : i32
    %c0_i32_0 = arith.constant 0 : i32
    %c0_i32_1 = arith.constant 0 : i32
    return %c0_i32, %c0_i32_0 : i32, i32
  }
  func.func @transform_5(%arg0: i32) -> (i32, i32) {
    %c0_i32 = arith.constant 0 : i32
    %c0_i32_0 = arith.constant 0 : i32
    %c0_i32_1 = arith.constant 0 : i32
    return %c0_i32, %c0_i32_0 : i32, i32
  }
  func.func @transform_6(%arg0: i32) -> (i32, i32) {
    %c0_i32 = arith.constant 0 : i32
    %c0_i32_0 = arith.constant 0 : i32
    %c0_i32_1 = arith.constant 0 : i32
    return %c0_i32, %c0_i32_0 : i32, i32
  }
  func.func @transform_7(%arg0: i32) -> (i32, i32) {
    %c0_i32 = arith.constant 0 : i32
    %c0_i32_0 = arith.constant 0 : i32
    return %arg0, %c0_i32 : i32, i32
  }
  func.func @transform_8(%arg0: i32) -> (i32, i32) {
    %c0_i32 = arith.constant 0 : i32
    %c0_i32_0 = arith.constant 0 : i32
    return %arg0, %c0_i32 : i32, i32
  }
}

</mosaic_0001>

<bundles_post_ra>
// kernel: tpu_custom_call.1
= control target key start
LH: loop header
LB: loop body
LE: loop exit
PB: predicated region body
PF: predicated region fallthrough
CT: control target
= control target key end

     0   :  { %14 = vsyncpa [#allocation3], 0  ;;  %s2412_s0 = inlined_call_operand.hbm [shape: f32[16,32], index: 0, kind: input, shape index: {}]   ;;  %s2413_s1 = inlined_call_operand.vmem [shape: f32[32,96], index: 1, kind: input, shape index: {}]   ;;  %s2414_s2 = inlined_call_operand.vmem [shape: f32[32,32], index: 2, kind: input, shape index: {}]   ;;  %s2415_s3 = inlined_call_operand.vmem [shape: f32[32,64], index: 3, kind: input, shape index: {}]   ;;  %s2416_s4 = inlined_call_operand.vmem [shape: f32[64,32], index: 4, kind: input, shape index: {}]   ;;  %s2417_s5 = inlined_call_operand.vmem [shape: f32[9,32], index: 5, kind: input, shape index: {}]   ;;  %s2418_s6 = inlined_call_operand.vmem [shape: f32[1,64], index: 6, kind: input, shape index: {}]   ;;  %s2419_s7 = inlined_call_operand.hbm [shape: f32[16,32], index: 7, kind: output, shape index: {0}]   ;;  %s2420_s8 = inlined_call_operand.hbm [shape: f32[16,128], index: 8, kind: output, shape index: {1}]  }
   0x1   :  { %16 = vsyncpa [#allocation3 + $0x1], 0 }
   0x2   :  { %17 = vsyncpa [#allocation4], 0 }
   0x3   :  { %19 = vsyncpa [#allocation4 + $0x1], 0 }
   0x4   :  { %20 = vsyncpa [#allocation7], 0 }
   0x5   :  { %22 = vsyncpa [#allocation7 + $0x1], 0  ;;  %s2037_s27 = smov 0   ;;  %s2039_s28 = smov 0  }
   0x6   :  { %s2041_s29 = smov 0   ;;  %s2043_s30 = smov 0  }
   0x7 LB: > { %s2058_s9 = sadd.s32 4294967295, %s1969_s30   ;;  %s1557_s10 = sadd.s32 4294967294, %s1969_s30   ;;  %s1969_s30 = sphi %s2043_s30, %s2437_s30   ;;  %s1965_s29 = sphi %s2041_s29, %s2436_s29   ;;  %s1961_s28 = sphi %s2039_s28, %s2435_s28   ;;  %s1957_s27 = sphi %s2037_s27, %s2434_s27  }
   0x8   : > { %s2062_s11 = sadd.s32 1, %s1969_s30   ;;  %s35_s12 = sadd.s32 1, %s1965_s29 }
   0x9   : > { %s32_s13 = ssub.s32 %s1969_s30, %s2062_s11  ;;  %p42_p0 = scmp.ne.s32.totalorder %s1965_s29, %s1961_s28 }
   0xa   : > { %p33_p1 = scmp.eq.s32.totalorder %s32_s13, 0  ;;  %p43_p2 = scmp.eq.s32.totalorder %s1969_s30, 0 }
   0xb   : > { %p48_p3 = scmp.ne.s32.totalorder %s1961_s28, %s1957_s27  ;;  %p49_p4 = scmp.eq.s32.totalorder %s2058_s9, 0 }
   0xc   : > { %s2074_s14 = scalar_select %p33_p1, %s1965_s29, %s35_s12  }
   0xd   : > { %p2076_p5 = por %p43_p2, %p42_p0  ;;  %p2080_p6 = por %p49_p4, %p48_p3 }
   0xe   : > { %p198_p7 = scmp.eq.s32.totalorder %s2058_s9, 1  ;;  %p204_p8 = scmp.eq.s32.totalorder %s1557_s10, 1 }
   0xf   : > { %p1769_p10 = scmp.lt.s32.totalorder %s1969_s30, 2  ;;  %s268_s19 = sand.u32 1, %s1965_s29  }
  0x10   : > { %p2087_p11 = por %p198_p7, %p42_p0  ;;  %p2091_p12 = por %p204_p8, %p48_p3 }
  0x11   : > { %s1561_s20 = sshll.u32 %s1969_s30, 7  ;;  %s1560_s21 = sshll.u32 %s268_s19, 3 }
  0x12   : > { %s2425_s17 = scalar_select %p2087_p11, 1, 0 }
  0x13   : > { %s2426_s18 = scalar_select %p2091_p12, 1, 0 }
  0x14   : > { %s2100_s24 = scalar_lea.hbm %s2412_s0, %s1561_s20  ;;  %s272_s25 = scalar_lea.vmem [#allocation2], %s1560_s21 }
  0x15   : > { %s279_s26 = sshll.u32 %s272_s25, 4  ;;  %p2104_p13 = pnand %p1769_p10, %p2076_p5  ;;  %s2108_s26 = int_to_ptr.vmem [resolvable:$true] %s279_s26 }
  0x16   : > { %s269_s12 = scalar_lea.sflag [#allocation3], %s268_s19  ;;  %s1841_s13 = scalar_lea.hbm %s2100_s24, 128 }
  0x17   : > { %p1842_p2 = scmp.ne.s32.totalorder %s2100_s24, %s1841_s13  ;;  %p1843_p3 = pneg %p2104_p13 }
  0x18   : > { %s1846_s21 = scalar_lea.hbm %s2412_s0, 256  ;;  %p1847_p5 = scmp.lt.u32.totalorder %s2100_s24, %s2412_s0 }
  0x19   : > { %p1844_p4 = pnand %p1843_p3, %p1842_p2  ;;  %p1848_p8 = scmp.lt.u32.totalorder %s1846_s21, %s1841_s13 }
  0x1a   : > { %p1850_p9 = scmp.lt.u32.totalorder %s1841_s13, %s2100_s24 }
  0x1b   : > { %p1845_p7 = pneg %p1844_p4  ;;  %p1849_p10 = por %p1848_p8, %p1847_p5 }
  0x1d   : > { %p1851_p0 = por %p1850_p9, %p1849_p10 }
  0x1f   : > { %p1852_p1 = pnand %p1851_p0, %p1845_p7 }
  0x21   : > { %1855 = shalt.err (!%p1852_p1)
}
  0x22   : > { %s1856_s19 = scalar_lea.vmem %s2108_s26, 128  ;;  %s1971_s25 = smov [#allocation2]  }
  0x23   : > { %p1857_p2 = scmp.ne.s32.totalorder %s2108_s26, %s1856_s19  ;;  %s1861_s15 = sshll.u32 %s1971_s25, 4  ;;  %s1862_s15 = int_to_ptr.vmem [resolvable:$false] %s1861_s15 }
  0x24   : > { %s1863_s20 = scalar_lea.vmem %s1862_s15, 256  ;;  %p1864_p11 = scmp.lt.s32.totalorder %s2108_s26, %s1862_s15 }
  0x25   : > { %p1859_p4 = pnand %p1857_p2, %p1843_p3  ;;  %p1865_p5 = scmp.lt.s32.totalorder %s1863_s20, %s1856_s19 }
  0x27   : > { %p1860_p12 = pneg %p1859_p4  ;;  %p1866_p8 = por %p1865_p5, %p1864_p11 }
  0x29   : > { %p1867_p9 = pnand %p1866_p8, %p1860_p12 }
  0x2b   : > { %1870 = shalt.err (!%p1867_p9)
}
  0x2c   : > { %1761 = dma.hbm_to_vmem [thread:$0]  (!%p2104_p13), %s2100_s24, 128, %s2108_s26, %s269_s12  }
  0x2d   : > { %p2428_p0 = scmp.lt.s32.totalorder %s1969_s30, 3  ;;  %p2429_p1 = scmp.ge.s32.totalorder %s1969_s30, 1 }
  0x2f   : > { %p285_p3 = pnand %p2429_p1, %p2428_p0 }
  0x30   : > { %s2142_s13 = sand.u32 (!%p285_p3), 1, %s1961_s28  }
  0x31   : > { %288 = sbr.rel (%p285_p3) target bundleno = 2553 (0x9f9), region = 48  ;;  %s2145_s21 = sshll.u32 (!%p285_p3), %s2142_s13, 3 }
  0x32   : > { %s291_s22 = scalar_lea.sflag (!%p285_p3), [#allocation3], %s2142_s13  ;;  %s294_s10 = scalar_lea.vmem (!%p285_p3), [#allocation2], %s2145_s21 }
  0x38   : > { %1944 = dma.done.wait (%p2080_p6), %s291_s22, 128  }
  0x39   : > { %1946 = vsyncadd (%p2080_p6), %s291_s22, 4294967168  ;;  %vm335_vm0 = vcmask 261120   ;;  %v2153_v0 = vld [vmem:[%s294_s10] sm:$0xff]  ;;  %v362_v9 = vld [vmem:[%s2413_s1 + $0x10] sm:$0xff]  ;;  %v1972_v10 = vmov 0.0|0.0   ;;  %vm1973_vm1 = vmmov 0   ;;  %v350_v15 = vlaneseq }
  0x3a   : > { %v336_v1 = vsel %vm335_vm0, %v2153_v0, 0.0  ;;  %v360_v7 = vld [vmem:[%s2413_s1] sm:$0xff]  ;;  %v361_v8 = vld [vmem:[%s2413_s1 + $0x8] sm:$0xff]  ;;  %1722 = vmatprep.subr.bf16.mxu1 %v1972_v10  ;;  %v363_v12 = vld [vmem:[%s2413_s1 + $0x18] sm:$0xff]  ;;  %v1974_v13 = vmov 0.0   ;;  %s1975_s10 = smov 32  }
  0x3b   : > { %337 = vadd.xlane.f32.xlu0 %v336_v1  ;;  %v1723_v11 = vpack.c.bf16 %v361_v8, %v360_v7  ;;  %1638 = vmatprep.mubr.msk.f32.mxu1 %vm1973_vm1, %v1974_v13  ;;  %v1726_v14 = vpack.c.bf16 %v363_v12, %v362_v9  ;;  %v2179_v16 = vshrl.u32 %v350_v15, 7  ;;  %v2185_v18 = vld [vmem:[%s2417_s5] sm:$0xff]  ;;  %s1976_s24 = smov 88   ;;  %s1977_s26 = smov 96   ;;  %vm463_vm2 = vcmask 64512  }
  0x3c   : > { %1651 = vmatprep.subr.mxu0 %v1974_v13  ;;  %1653 = vmatprep.mubr.msk.f32.mxu0 %vm1973_vm1, %v1974_v13  ;;  %s1978_s16 = smov 120   ;;  %s1979_s12 = smov 80   ;;  %v1567_v57 = vld [vmem:[%s2417_s5 + $0x8] ss:$0 sm:$0xff]  ;;  %vm1138_vm3 = vcmask 130048   ;;  %vm1140_vm4 = vcmask 195584  }
  0x3d   : > { %1724 = vmatpush3.bf16.msra.mxu1 %v1723_v11  ;;  %v444_v17 = vsub.s32 7, %v2179_v16  ;;  %v352_v23 = vsub.s32 0, %v2179_v16  ;;  %v357_v24 = vsub.s32 1, %v2179_v16  ;;  %v439_v31 = vsub.s32 6, %v2179_v16  ;;  %s1980_s23 = smov 112   ;;  %s1981_s19 = smov 72  }
  0x3e   : > { %1725 = vmatprep.subr.bf16.mxu1 %v1972_v10  ;;  %s1982_s25 = smov 104   ;;  %s1983_s22 = smov 64   ;;  %vm1347_vm5 = vcmask 523264  }
  0x3f   : > { %v445_v19 = vrot.slane %v2185_v18, %v444_v17  ;;  %v353_v25 = vrot.slane %v2185_v18, %v352_v23  ;;  %v358_v28 = vrot.slane %v2185_v18, %v357_v24  ;;  %v440_v34 = vrot.slane %v2185_v18, %v439_v31  ;;  %p2430_p11 = scmp.ne.s32.totalorder %s2425_s17, 0  ;;  %s1990_s15 = smov [#allocation6]  }
  0x40   : > { %s1875_s20 = sshll.u32 %s1990_s15, 4  ;;  %s1876_s20 = int_to_ptr.vmem [resolvable:$false] %s1875_s20 }
  0x41   : > { %1727 = vmatpush3.bf16.msra.mxu1 %v1726_v14  ;;  %447 = vrot.lane.b32.xlu1 %v445_v19, %s1975_s10  ;;  %s1984_s10 = smov 56  }
  0x42   : > { %1641 = vmatprep.subr.mxu1 %v1974_v13 }
  0xb3   : > { %v448_v32 = vpop.permute.xlu1 %447 }
  0xc8   : > { %v338_v2 = vpop.xlane.xlu0 %337 }
  0xc9   : > { %v340_v3 = vmul.f32 0.03125, %v338_v2 }
  0xcb   : > { %v341_v4 = vsub.f32 %v2153_v0, %v340_v3 }
  0xcd   : > { %v342_v5 = vmul.f32 %v341_v4, %v341_v4 }
  0xcf   : > { %v343_v6 = vsel %vm335_vm0, %v342_v5, 0.0 }
  0xd0   : > { %344 = vadd.xlane.f32.xlu0 %v343_v6 }
 0x15d   : > { %v345_v20 = vpop.xlane.xlu0 %344 }
 0x15e   : > { %v346_v21 = vmul.f32 0.03125, %v345_v20 }
 0x160   : > { %v347_v22 = vadd.f32 1e-05, %v346_v21 }
 0x162   : > { %1821 = vrsqrt.f32 %v347_v22 }
 0x16c   : > { %v1822_v26 = vpop.eup %1821 }
 0x16d   : > { %v349_v27 = vmul.f32 %v1822_v26, %v341_v4 }
 0x16f   : > { %v354_v29 = vmul.f32 %v353_v25, %v349_v27 }
 0x171   : > { %v359_v30 = vadd.f32 %v358_v28, %v354_v29 }
 0x173   : > { %1639 = vmatmul.mubr.msk.f32.vlgmr.msra.gmra.mrb[0].mxu1 %vm335_vm0, %v359_v30 }
 0x174   : > { %1643 = vmatprep.mubr.msk.f32.mxu1 %vm1973_vm1, %v1974_v13 }
 0x246   : > { %v2196_v33 = vpop.f32.mrb[0].mxu1 }
 0x247   : > { %v450_v35 = vadd.f32 %v448_v32, %v2196_v33  ;;  %v1640_v36 = vpop.f32.mrb[1].mxu1  ;;  %v441_v37 = vadd.f32 %v440_v34, %v2196_v33 }
 0x249   : > { %629 = vrot.lane.b32.xlu0 %v450_v35, %s1976_s24  ;;  %461 = vrot.lane.b32.xlu1 %v450_v35, %s1977_s26  ;;  %s1985_s24 = smov 48   ;;  %s1986_s26 = smov 40  }
 0x24d   : > { %627 = vrot.lane.b32.xlu1 %v441_v37, %s1978_s16  ;;  %s331_s16 = scalar_lea.vmem [#allocation6], %s2145_s21 }
 0x251   : > { %795 = vrot.lane.b32.xlu1 %v450_v35, %s1979_s12  ;;  %s1989_s12 = smov 24  }
 0x255   : > { %793 = vrot.lane.b32.xlu1 %v441_v37, %s1980_s23  ;;  %s1455_s23 = sshll.u32 %s331_s16, 4  ;;  %s1456_s23 = int_to_ptr.vmem [resolvable:$true] %s1455_s23 }
 0x256   : > { %p1878_p7 = scmp.lt.s32.totalorder %s1456_s23, %s1876_s20 }
 0x259   : > { %961 = vrot.lane.b32.xlu1 %v450_v35, %s1981_s19  ;;  %s1429_s19 = scalar_lea.sflag [#allocation7], %s2142_s13 }
 0x25d   : > { %959 = vrot.lane.b32.xlu1 %v441_v37, %s1982_s25  ;;  %s1871_s25 = scalar_lea.vmem %s1456_s23, 128 }
 0x25e   : > { %p1872_p6 = scmp.ne.s32.totalorder %s1456_s23, %s1871_s25 }
 0x260   : > { %p1873_p12 = pnand %p1872_p6, %p2430_p11 }
 0x262   : > { %p1874_p13 = pneg %p1873_p12 }
 0x2bb   : > { %v630_v38 = vpop.permute.xlu0 %629  ;;  %v462_v39 = vpop.permute.xlu1 %461 }
 0x2bc   : > { %1642 = vmatpush3.xpose.msk.msra.mxu1 %vm463_vm2, %v462_v39  ;;  %1652 = vmatpush3.xpose.msk.msra.mxu0 %vm463_vm2, %v630_v38 }
 0x2bd   : > { %1661 = vmatprep.subr.mxu0 %v1974_v13  ;;  %1646 = vmatprep.subr.mxu1 %v1974_v13 }
 0x2bf   : > { %v628_v40 = vpop.permute.xlu1 %627  ;;  %1644 = vmatmul.mubr.msk.f32.vlgmr.msra.gmra.mrb[2].mxu1 %vm463_vm2, %v441_v37 }
 0x2c0   : > { %1654 = vmatmul.mubr.msk.f32.vlgmr.msra.gmra.mrb[0].mxu0 %vm463_vm2, %v628_v40  ;;  %1648 = vmatprep.mubr.msk.f32.mxu1 %vm1973_vm1, %v1974_v13 }
 0x2c1   : > { %1663 = vmatprep.mubr.msk.f32.mxu0 %vm1973_vm1, %v1974_v13 }
 0x2c3   : > { %v796_v41 = vpop.permute.xlu1 %795 }
 0x2c4   : > { %1662 = vmatpush3.xpose.msk.msra.mxu0 %vm463_vm2, %v796_v41 }
 0x2c5   : > { %1671 = vmatprep.subr.mxu0 %v1974_v13 }
 0x2c7   : > { %v794_v42 = vpop.permute.xlu1 %793 }
 0x2c8   : > { %1664 = vmatmul.mubr.msk.f32.vlgmr.msra.gmra.mrb[2].mxu0 %vm463_vm2, %v794_v42  ;;  %v1142_v42 = vld [vmem:[%s2414_s2] sm:$0xff] }
 0x2c9   : > { %1673 = vmatprep.mubr.msk.f32.mxu0 %vm1973_vm1, %v1974_v13 }
 0x2cb   : > { %v962_v43 = vpop.permute.xlu1 %961 }
 0x2cc   : > { %1672 = vmatpush3.xpose.msk.msra.mxu0 %vm463_vm2, %v962_v43  ;;  %v1143_v43 = vld [vmem:[%s2414_s2 + $0x8] sm:$0xff] }
 0x2cd   : > { %1728 = vmatprep.subr.bf16.mxu0 %v1972_v10 }
 0x2cf   : > { %v960_v44 = vpop.permute.xlu1 %959 }
 0x2d0   : > { %1674 = vmatmul.mubr.msk.f32.vlgmr.msra.gmra.mrb[4].mxu0 %vm463_vm2, %v960_v44  ;;  %v1729_v44 = vpack.c.bf16 %v1143_v43, %v1142_v42 }
 0x2d1   : > { %1689 = vmatprep.mubr.msk.f32.mxu0 %vm1973_vm1, %v1974_v13 }
 0x2d2   : > { %1730 = vmatpush3.bf16.msra.mxu0 %v1729_v44 }
 0x2d3   : > { %1731 = vmatprep.subr.bf16.mxu0 %v1972_v10 }
 0x392   : > { %v535_v45 = vpop.f32.mrb[2].mxu1 }
 0x393   : > { %v1645_v46 = vpop.f32.mrb[3].mxu1  ;;  %v701_v47 = vpop.f32.mrb[0].mxu0  ;;  %v539_v48 = vsel %vm463_vm2, %v535_v45, -inf }
 0x394   : > { %v1655_v49 = vpop.f32.mrb[1].mxu0  ;;  %540 = vmax.xlane.f32.xlu1 %v539_v48  ;;  %v705_v50 = vsel %vm463_vm2, %v701_v47, -inf  ;;  %v1145_v46 = vld [vmem:[%s2414_s2 + $0x18] sm:$0xff] }
 0x395   : > { %706 = vmax.xlane.f32.xlu0 %v705_v50 }
 0x39b   : > { %v867_v51 = vpop.f32.mrb[2].mxu0 }
 0x39c   : > { %v1665_v52 = vpop.f32.mrb[3].mxu0  ;;  %v871_v53 = vsel %vm463_vm2, %v867_v51, -inf }
 0x39d   : > { %872 = vmax.xlane.f32.xlu0 %v871_v53 }
 0x3a3   : > { %v1033_v54 = vpop.f32.mrb[4].mxu0 }
 0x3a4   : > { %v1675_v55 = vpop.f32.mrb[5].mxu0  ;;  %v1037_v56 = vsel %vm463_vm2, %v1033_v54, -inf }
 0x3a5   : > { %1038 = vmax.xlane.f32.xlu1 %v1037_v56 }
 0x3b3   : > { %456 = vrot.lane.b32.xlu0 %v1567_v57, %s1983_s22 }
 0x421   : > { %v541_v58 = vpop.xlane.xlu1 %540 }
 0x422   : > { %v542_v59 = vsub.f32 %v535_v45, %v541_v58  ;;  %v707_v60 = vpop.xlane.xlu0 %706  ;;  %v1144_v45 = vld [vmem:[%s2414_s2 + $0x10] sm:$0xff] }
 0x423   : > { %v708_v61 = vsub.f32 %v701_v47, %v707_v60  ;;  %v1732_v47 = vpack.c.bf16 %v1145_v46, %v1144_v45 }
 0x424   : > { %v543_v62 = vmul.f32 1.442695, %v542_v59 }
 0x425   : > { %v709_v63 = vmul.f32 1.442695, %v708_v61  ;;  %1733 = vmatpush3.bf16.msra.mxu0 %v1732_v47 }
 0x426   : > { %1823 = vpow2.f32 %v543_v62  ;;  %1740 = vmatprep.subr.bf16.mxu0 %v1972_v10  ;;  %v1148_v62 = vsub.s32 4, %v2179_v16 }
 0x427   : > { %1825 = vpow2.f32 %v709_v63 }
 0x428   : > { %v1149_v63 = vrot.slane %v2185_v18, %v1148_v62 }
 0x42a   : > { %v873_v1 = vpop.xlane.xlu0 %872 }
 0x42b   : > { %v874_v2 = vsub.f32 %v867_v51, %v873_v1 }
 0x42d   : > { %v875_v3 = vmul.f32 1.442695, %v874_v2 }
 0x42e   : > { %v457_v4 = vpop.permute.xlu0 %456 }
 0x42f   : > { %1827 = vpow2.f32 %v875_v3  ;;  %v459_v5 = vadd.f32 %v457_v4, %v2196_v33 }
 0x430   : > { %v1824_v6 = vpop.eup %1823 }
 0x431   : > { %717 = vrot.lane.b32.xlu0 %v459_v5, %s1984_s10  ;;  %v545_v7 = vsel %vm463_vm2, %v1824_v6, 0.0  ;;  %v1826_v8 = vpop.eup %1825  ;;  %s2422_s10 = sshll.u32 %s2058_s9, 7 }
 0x432   : > { %546 = vadd.xlane.f32.xlu1 %v545_v7  ;;  %v1039_v9 = vpop.xlane.xlu1 %1038  ;;  %v711_v14 = vsel %vm463_vm2, %v1826_v8, 0.0 }
 0x433   : > { %v1040_v11 = vsub.f32 %v1033_v54, %v1039_v9 }
 0x435   : > { %v1041_v12 = vmul.f32 1.442695, %v1040_v11  ;;  %883 = vrot.lane.b32.xlu0 %v459_v5, %s1985_s24  ;;  %s1987_s24 = smov 8   ;;  %v1251_v11 = vld [vmem:[%s2415_s3] sm:$0xff] }
 0x436   : > { %712 = vadd.xlane.f32.xlu1 %v711_v14  ;;  %v1253_v14 = vld [vmem:[%s2415_s3 + $0x10] sm:$0xff] }
 0x437   : > { %1829 = vpow2.f32 %v1041_v12 }
 0x439   : > { %v1828_v15 = vpop.eup %1827  ;;  %1049 = vrot.lane.b32.xlu0 %v459_v5, %s1986_s26  ;;  %s1988_s26 = smov 16  }
 0x43a   : > { %v877_v17 = vsel %vm463_vm2, %v1828_v15, 0.0 }
 0x43b   : > { %878 = vadd.xlane.f32.xlu1 %v877_v17 }
 0x441   : > { %v1830_v19 = vpop.eup %1829 }
 0x442   : > { %v1043_v20 = vsel %vm463_vm2, %v1830_v19, 0.0 }
 0x443   : > { %1044 = vadd.xlane.f32.xlu1 %v1043_v20  ;;  %v1336_v20 = vld [vmem:[%s2416_s4 + $0x8] sm:$0xff] }
 0x454   : > { %551 = vrot.lane.b32.xlu1 %v459_v5, %s1983_s22  ;;  %s1877_s22 = scalar_lea.vmem %s1876_s20, 256 }
 0x455   : > { %p1879_p10 = scmp.lt.s32.totalorder %s1877_s22, %s1871_s25 }
 0x457   : > { %p1880_p2 = por %p1879_p10, %p1878_p7 }
 0x459   : > { %p1881_p4 = pnand %p1880_p2, %p1874_p13 }
 0x4a3   : > { %v718_v26 = vpop.permute.xlu0 %717 }
 0x4a7   : > { %v884_v32 = vpop.permute.xlu0 %883 }
 0x4ab   : > { %v1050_v38 = vpop.permute.xlu0 %1049 }
 0x4bf   : > { %v547_v21 = vpop.xlane.xlu1 %546 }
 0x4c0   : > { %1831 = vrcp.f32 %v547_v21  ;;  %v1337_v21 = vld [vmem:[%s2416_s4 + $0x10] sm:$0xff] }
 0x4c3   : > { %v713_v22 = vpop.xlane.xlu1 %712 }
 0x4c4   : > { %1833 = vrcp.f32 %v713_v22 }
 0x4c8   : > { %v879_v23 = vpop.xlane.xlu1 %878 }
 0x4c9   : > { %1835 = vrcp.f32 %v879_v23  ;;  %v1338_v23 = vld [vmem:[%s2416_s4 + $0x18] sm:$0xff] }
 0x4ca   : > { %v1832_v25 = vpop.eup %1831 }
 0x4cb   : > { %v549_v28 = vmul.f32 %v1832_v25, %v1824_v6  ;;  %v1339_v25 = vld [vmem:[%s2416_s4 + $0x20] sm:$0xff] }
 0x4ce   : > { %v1834_v27 = vpop.eup %1833 }
 0x4cf   : > { %v715_v31 = vmul.f32 %v1834_v27, %v1826_v8 }
 0x4d0   : > { %v1045_v24 = vpop.xlane.xlu1 %1044 }
 0x4d1   : > { %1837 = vrcp.f32 %v1045_v24  ;;  %v716_v34 = vadd.f32 %v715_v31, %v549_v28  ;;  %v1744_v24 = vpack.c.bf16 %v1338_v23, %v1337_v21 }
 0x4d3   : > { %v1836_v30 = vpop.eup %1835 }
 0x4d4   : > { %v552_v29 = vpop.permute.xlu1 %551  ;;  %v881_v33 = vmul.f32 %v1836_v30, %v1828_v15  ;;  %v1254_v15 = vld [vmem:[%s2415_s3 + $0x18] sm:$0xff] }
 0x4d5   : > { %1647 = vmatpush3.msra.mxu1 %v552_v29  ;;  %v1738_v17 = vpack.c.bf16 %v1254_v15, %v1253_v14 }
 0x4d6   : > { %1649 = vmatmul.mubr.msk.f32.vlgmr.msra.gmra.mrb[4].mxu1 %vm463_vm2, %v549_v28  ;;  %1656 = vmatprep.subr.mxu1 %v1974_v13  ;;  %v882_v37 = vadd.f32 %v881_v33, %v716_v34 }
 0x4d7   : > { %1657 = vmatpush3.msra.mxu1 %v718_v26  ;;  %1658 = vmatprep.mubr.msk.f32.mxu1 %vm1973_vm1, %v1974_v13  ;;  %v1340_v26 = vld [vmem:[%s2416_s4 + $0x28] sm:$0xff] }
 0x4d8   : > { %1666 = vmatprep.subr.mxu1 %v1974_v13  ;;  %v1747_v27 = vpack.c.bf16 %v1340_v26, %v1339_v25 }
 0x4da   : > { %1659 = vmatmul.mubr.msk.f32.vlgmr.msra.gmra.mrb[6].mxu1 %vm463_vm2, %v715_v31  ;;  %v1242_v31 = vsub.s32 2, %v2179_v16 }
 0x4db   : > { %v1838_v35 = vpop.eup %1837  ;;  %1667 = vmatpush3.msra.mxu1 %v884_v32  ;;  %1668 = vmatprep.mubr.msk.f32.mxu1 %vm1973_vm1, %v1974_v13  ;;  %v1247_v32 = vsub.s32 3, %v2179_v16 }
 0x4dc   : > { %v1047_v36 = vmul.f32 %v1838_v35, %v1830_v19  ;;  %1676 = vmatprep.subr.mxu1 %v1974_v13  ;;  %v1335_v19 = vld [vmem:[%s2416_s4] sm:$0xff] }
 0x4dd   : > { %v1741_v22 = vpack.c.bf16 %v1336_v20, %v1335_v19 }
 0x4de   : > { %1669 = vmatmul.mubr.msk.f32.vlgmr.msra.gmra.mrb[8].mxu1 %vm463_vm2, %v881_v33  ;;  %v1048_v39 = vadd.f32 %v1047_v36, %v882_v37  ;;  %v1243_v33 = vrot.slane %v2185_v18, %v1242_v31 }
 0x4df   : > { %1677 = vmatpush3.msra.mxu1 %v1050_v38  ;;  %1678 = vmatprep.mubr.msk.f32.mxu1 %vm1973_vm1, %v1974_v13 }
 0x4e0   : > { %1734 = vmatprep.subr.bf16.mxu1 %v1972_v10  ;;  %v1224_v40 = vmul.f32 0.25, %v1048_v39  ;;  %v1342_v39 = vld [vmem:[%s2416_s4 + $0x38] sm:$0xff] }
 0x4e2   : > { %1679 = vmatmul.mubr.msk.f32.vlgmr.msra.gmra.mrb[10].mxu1 %vm463_vm2, %v1047_v36  ;;  %v1225_v41 = vsel %vm463_vm2, %v1224_v40, 0.0  ;;  %v1248_v36 = vrot.slane %v2185_v18, %v1247_v32 }
 0x4e3   : > { %1700 = vmatprep.mubr.msk.f32.mxu1 %vm1973_vm1, %v1974_v13  ;;  %1226 = vst [vmem:[%s331_s16] sm:$0xff] %v1225_v41  ;;  %v1581_v41 = vld [vmem:[%s2418_s6] ss:$0 sm:$0xff] }
 0x5a9   : > { %v623_v48 = vpop.f32.mrb[4].mxu1 }
 0x5aa   : > { %v1650_v49 = vpop.f32.mrb[5].mxu1 }
 0x5ad   : > { %v789_v50 = vpop.f32.mrb[6].mxu1 }
 0x5ae   : > { %1126 = vrot.lane.b32.xlu0 %v789_v50, %s1987_s24  ;;  %v1660_v51 = vpop.f32.mrb[7].mxu1 }
 0x5b1   : > { %v955_v52 = vpop.f32.mrb[8].mxu1 }
 0x5b2   : > { %1130 = vrot.lane.b32.xlu1 %v955_v52, %s1988_s26  ;;  %v1670_v53 = vpop.f32.mrb[9].mxu1 }
 0x5b5   : > { %v1121_v54 = vpop.f32.mrb[10].mxu1 }
 0x5b6   : > { %1134 = vrot.lane.b32.xlu0 %v1121_v54, %s1989_s12  ;;  %v1680_v55 = vpop.f32.mrb[11].mxu1  ;;  %s2336_s12 = scalar_lea.hbm %s2420_s8, %s2422_s10 }
 0x620   : > { %v1127_v56 = vpop.permute.xlu0 %1126 }
 0x621   : > { %v1137_v58 = vsel %vm463_vm2, %v623_v48, %v1127_v56 }
 0x624   : > { %v1131_v57 = vpop.permute.xlu1 %1130 }
 0x625   : > { %v1139_v59 = vsel %vm1138_vm3, %v1137_v58, %v1131_v57 }
 0x628   : > { %v1135_v60 = vpop.permute.xlu0 %1134 }
 0x629   : > { %v1141_v61 = vsel %vm1140_vm4, %v1139_v59, %v1135_v60 }
 0x62a   : > { %1690 = vmatmul.mubr.msk.f32.vlgmr.msra.gmra.mrb[6].mxu0 %vm335_vm0, %v1141_v61 }
 0x62b   : > { %1719 = vmatprep.mubr.msk.f32.mxu0 %vm1973_vm1, %v1974_v13  ;;  %1742 = vmatpush3.bf16.msra.mxu0 %v1741_v22 }
 0x62c   : > { %1743 = vmatprep.subr.bf16.mxu0 %v1972_v10 }
 0x62f   : > { %1745 = vmatpush3.bf16.msra.mxu0 %v1744_v24 }
 0x630   : > { %1746 = vmatprep.subr.bf16.mxu0 %v1972_v10 }
 0x633   : > { %1748 = vmatpush3.bf16.msra.mxu0 %v1747_v27 }
 0x634   : > { %1749 = vmatprep.subr.bf16.mxu0 %v1972_v10 }
 0x6fd   : > { %v1219_v1 = vpop.f32.mrb[6].mxu0 }
 0x6fe   : > { %v1220_v2 = vadd.f32 %v1219_v1, %v1149_v63  ;;  %v1691_v3 = vpop.f32.mrb[7].mxu0 }
 0x700   : > { %v2276_v4 = vadd.f32 %v1220_v2, %v2153_v0  ;;  %v1252_v0 = vld [vmem:[%s2415_s3 + $0x8] sm:$0xff] }
 0x701   : > { %v1735_v12 = vpack.c.bf16 %v1252_v0, %v1251_v11 }
 0x702   : > { %v1227_v5 = vsel %vm335_vm0, %v2276_v4, 0.0 }
 0x703   : > { %1228 = vadd.xlane.f32.xlu1 %v1227_v5  ;;  %1736 = vmatpush3.bf16.msra.mxu1 %v1735_v12 }
 0x704   : > { %1737 = vmatprep.subr.bf16.mxu1 %v1972_v10  ;;  %v1341_v10 = vld [vmem:[%s2416_s4 + $0x30] sm:$0xff] }
 0x705   : > { %v1750_v40 = vpack.c.bf16 %v1342_v39, %v1341_v10 }
 0x707   : > { %1739 = vmatpush3.bf16.msra.mxu1 %v1738_v17  ;;  %1751 = vmatpush3.bf16.msra.mxu0 %v1750_v40 }
 0x790   : > { %v1229_v6 = vpop.xlane.xlu1 %1228 }
 0x791   : > { %v1230_v7 = vmul.f32 0.03125, %v1229_v6 }
 0x793   : > { %v1231_v8 = vsub.f32 %v2276_v4, %v1230_v7 }
 0x795   : > { %v1232_v9 = vmul.f32 %v1231_v8, %v1231_v8 }
 0x797   : > { %v1233_v13 = vsel %vm335_vm0, %v1232_v9, 0.0 }
 0x798   : > { %1234 = vadd.xlane.f32.xlu0 %v1233_v13 }
 0x825   : > { %v1235_v28 = vpop.xlane.xlu0 %1234 }
 0x826   : > { %v1236_v29 = vmul.f32 0.03125, %v1235_v28 }
 0x828   : > { %v1237_v30 = vadd.f32 1e-05, %v1236_v29 }
 0x82a   : > { %1839 = vrsqrt.f32 %v1237_v30 }
 0x834   : > { %v1840_v34 = vpop.eup %1839 }
 0x835   : > { %v1239_v35 = vmul.f32 %v1840_v34, %v1231_v8 }
 0x837   : > { %v1244_v37 = vmul.f32 %v1243_v33, %v1239_v35 }
 0x839   : > { %v1249_v38 = vadd.f32 %v1248_v36, %v1244_v37 }
 0x83b   : > { %1701 = vmatmul.mubr.msk.f32.vlgmr.msra.gmra.mrb[12].mxu1 %vm335_vm0, %v1249_v38 }
 0x90e   : > { %v1330_v42 = vpop.f32.mrb[12].mxu1 }
 0x90f   : > { %v1331_v43 = vadd.f32 %v1581_v41, %v1330_v42  ;;  %v1702_v44 = vpop.f32.mrb[13].mxu1 }
 0x911   : > { %v1334_v45 = vmax.f32 %v1331_v43, 0.0 }
 0x913   : > { %1720 = vmatmul.mubr.msk.f32.vlgmr.msra.gmra.mrb[8].mxu0 %vm1347_vm5, %v1334_v45 }
 0x914   : > { %1884 = shalt.err (!%p1881_p4)
}
 0x915   : > { %s1885_s16 = scalar_lea.hbm %s2336_s12, 128  ;;  %s1889_s15 = scalar_lea.hbm %s2420_s8, 256 }
 0x916   : > { %p1886_p5 = scmp.ne.s32.totalorder %s2336_s12, %s1885_s16  ;;  %p1890_p0 = scmp.lt.u32.totalorder %s2336_s12, %s2420_s8 }
 0x917   : > { %p1891_p1 = scmp.lt.u32.totalorder %s1889_s15, %s1885_s16  ;;  %p1893_p6 = scmp.lt.u32.totalorder %s1885_s16, %s2336_s12 }
 0x918   : > { %p1887_p8 = pnand %p1886_p5, %p2430_p11 }
 0x919   : > { %p1892_p3 = por %p1891_p1, %p1890_p0 }
 0x91a   : > { %p1888_p9 = pneg %p1887_p8 }
 0x91b   : > { %p1894_p12 = por %p1893_p6, %p1892_p3 }
 0x91d   : > { %p1895_p13 = pnand %p1894_p12, %p1888_p9 }
 0x91f   : > { %1898 = shalt.err (!%p1895_p13)
}
 0x920   : > { %1755 = dma.vmem_to_hbm [thread:$0]  (%p2430_p11), %s1456_s23, 128, %s2336_s12, %s1429_s19   ;;  %v1345_v46 = vsub.s32 5, %v2179_v16 }
 0x921   : > { %s324_s10 = scalar_lea.vmem [#allocation5], %s2145_s21  ;;  %s2431_s22 = sshll.u32 %s2058_s9, 7 }
 0x922   : > { %v1346_v47 = vrot.slane %v2185_v18, %v1345_v46  ;;  %s1442_s25 = sshll.u32 %s324_s10, 4  ;;  %s2367_s26 = scalar_lea.hbm %s2419_s7, %s2431_s22  ;;  %s2369_s25 = int_to_ptr.vmem [resolvable:$true] %s1442_s25 }
 0x923   : > { %s1424_s12 = scalar_lea.sflag [#allocation4], %s2142_s13  ;;  %s1899_s21 = scalar_lea.vmem %s2369_s25, 128 }
 0x924   : > { %p1900_p7 = scmp.ne.s32.totalorder %s2369_s25, %s1899_s21  ;;  %s1991_s23 = smov [#allocation5]  }
 0x925   : > { %s1903_s9 = sshll.u32 %s1991_s23, 4  ;;  %s1904_s9 = int_to_ptr.vmem [resolvable:$false] %s1903_s9 }
 0x926   : > { %p1901_p10 = pnand %p1900_p7, %p2430_p11  ;;  %s1905_s19 = scalar_lea.vmem %s1904_s9, 256 }
 0x927   : > { %p1906_p4 = scmp.lt.s32.totalorder %s2369_s25, %s1904_s9  ;;  %p1907_p5 = scmp.lt.s32.totalorder %s1905_s19, %s1899_s21 }
 0x928   : > { %p1902_p2 = pneg %p1901_p10 }
 0x929   : > { %p1908_p8 = por %p1907_p5, %p1906_p4 }
 0x92b   : > { %p1909_p9 = pnand %p1908_p8, %p1902_p2 }
 0x9e6   : > { %v1417_v48 = vpop.f32.mrb[8].mxu0 }
 0x9e7   : > { %v1418_v49 = vadd.f32 %v1417_v48, %v1346_v47  ;;  %v1721_v50 = vpop.f32.mrb[9].mxu0 }
 0x9e9   : > { %v1421_v51 = vadd.f32 %v1418_v49, %v2276_v4 }
 0x9eb   : > { %1422 = vst.msk [vmem:[%s324_s10] sm:$0xff] %vm335_vm0, %v1421_v51 }
 0x9ec   : > { %1912 = shalt.err (!%p1909_p9)
}
 0x9ed   : > { %s1913_s13 = scalar_lea.hbm %s2367_s26, 128  ;;  %s1917_s10 = scalar_lea.hbm %s2419_s7, 256 }
 0x9ee   : > { %p1914_p0 = scmp.ne.s32.totalorder %s2367_s26, %s1913_s13  ;;  %p1918_p6 = scmp.lt.u32.totalorder %s2367_s26, %s2419_s7 }
 0x9ef   : > { %p1919_p12 = scmp.lt.u32.totalorder %s1917_s10, %s1913_s13  ;;  %p1921_p7 = scmp.lt.u32.totalorder %s1913_s13, %s2367_s26 }
 0x9f0   : > { %p1915_p1 = pnand %p1914_p0, %p2430_p11 }
 0x9f1   : > { %p1920_p13 = por %p1919_p12, %p1918_p6 }
 0x9f2   : > { %p1916_p3 = pneg %p1915_p1 }
 0x9f3   : > { %p1922_p10 = por %p1921_p7, %p1920_p13 }
 0x9f5   : > { %p1923_p2 = pnand %p1922_p10, %p1916_p3 }
 0x9f7   : > { %1926 = shalt.err (!%p1923_p2)
}
 0x9f8   : > { %1754 = dma.vmem_to_hbm [thread:$0]  (%p2430_p11), %s2369_s25, 128, %s2367_s26, %s1424_s12  }
 0x9f9 PF: > { %s1467_s24 = sand.u32 1, %s1957_s27   ;;  %p2432_p4 = scmp.ne.s32.totalorder %s2426_s18, 0 }
 0x9fa   : > { %p2433_p5 = scmp.ge.s32.totalorder %s1969_s30, 2  ;;  %s1468_s21 = scalar_lea.sflag [#allocation4], %s1467_s24 }
 0x9fc   : > { %p1763_p8 = pnand %p2433_p5, %p2432_p4 }
 0x9fe   : > { %1948 = dma.done.wait (!%p1763_p8), %s1468_s21, 128  }
 0x9ff   : > { %1950 = vsyncadd (!%p1763_p8), %s1468_s21, 4294967168  ;;  %s1477_s23 = scalar_lea.sflag [#allocation7], %s1467_s24 }
 0xa00   : > { %1952 = dma.done.wait (!%p1763_p8), %s1477_s23, 128  }
 0xa01   : > { %1954 = vsyncadd (!%p1763_p8), %s1477_s23, 4294967168  ;;  %p25_p11 = scmp.ge.s32.totalorder %s2062_s11, 4   ;;  %s2434_s27 = smov %s1961_s28 }
 0xa02   : > { %s2435_s28 = smov %s1965_s29  ;;  %s2436_s29 = smov %s2074_s14 }
 0xa03   : > { %s2437_s30 = smov %s2062_s11  ;;  %27 = sbr.rel (!%p25_p11) target bundleno = 7 (0x7), region = 110 }
 0xa0a   :  { %1482 = vsyncpa [#allocation3], 1 }
 0xa0b   :  { %1484 = vsyncpa [#allocation3 + $0x1], 1 }
 0xa0c   :  { %1485 = vsyncpa [#allocation4], 1 }
 0xa0d   :  { %1487 = vsyncpa [#allocation4 + $0x1], 1 }
 0xa0e   :  { %1488 = vsyncpa [#allocation7], 1 }
 0xa0f   :  { %1490 = vsyncpa [#allocation7 + $0x1], 1 }

</bundles_post_ra>
